<compile_context>
chip_gen: v7x
topology: tpu7x:2x2x1
jax: 0.10.0
libtpu: 0.0.40
codegen_flags: <defaults>
</compile_context>

<pallas_src>
import math

import jax
import jax.numpy as jnp
from jax.experimental import pallas as pl
from jax.experimental.pallas import tpu as pltpu


def _round_up(n, m):
    return ((n + m - 1) // m) * m


def _mlp_kernel(x_ref, w1_ref, w2_ref, w3_ref, b_ref, o_ref):
    """Fused 3-layer MLP on one batch tile; all weights resident in VMEM.

    b_ref rows: [0]=b1, [1]=b2, [2]=b3 (each zero-padded to the lane width).
    f32 MXU accumulation; bias-add / ReLU in f32 (v5e-safe bf16 path).
    """
    h1_w = w1_ref.shape[1]
    h2_w = w2_ref.shape[1]
    out_w = w3_ref.shape[1]

    x = x_ref[...]

    # Layer 1: Linear + ReLU
    h1 = jnp.dot(x, w1_ref[...], preferred_element_type=jnp.float32)
    h1 = jnp.maximum(h1 + b_ref[0:1, :h1_w], 0.0)

    # Layer 2: Linear + ReLU
    h2 = jnp.dot(h1.astype(w2_ref.dtype), w2_ref[...],
                 preferred_element_type=jnp.float32)
    h2 = jnp.maximum(h2 + b_ref[1:2, :h2_w], 0.0)

    # Output layer: Linear (no activation); lane-dense (unmasked) store.
    out = jnp.dot(h2.astype(w3_ref.dtype), w3_ref[...],
                  preferred_element_type=jnp.float32)
    out = out + b_ref[2:3, :out_w]

    o_ref[...] = out.astype(o_ref.dtype)


def prepare_qnetwork_params(params, *, use_bf16=False):
    """One-time parameter preprocessing (hoisted out of the per-call path).

    * Pads the last layer to a multiple of 128 output columns so the kernel's
      final store is an unmasked lane-dense vst.
    * Stacks the three biases into one (3, lanes) f32 array (one DMA
      descriptor instead of three; static prefix slices in-kernel).
    * Optionally casts weights to bf16 (valid on v5e/v6e/v7x; accumulation
      stays f32 in the kernel).
    """
    (w1, b1), (w2, b2), (w3, b3) = params
    D_in, H1 = w1.shape
    H2 = w2.shape[1]
    D_out = w3.shape[1]
    D_out_p = _round_up(D_out, 128)

    if D_out_p != D_out:
        w3p = jnp.zeros((H2, D_out_p), w3.dtype).at[:, :D_out].set(w3)
    else:
        w3p = w3

    lanes = max(_round_up(H1, 128), _round_up(H2, 128), D_out_p)
    b_all = (jnp.zeros((3, lanes), jnp.float32)
             .at[0, :H1].set(b1.reshape(-1).astype(jnp.float32))
             .at[1, :H2].set(b2.reshape(-1).astype(jnp.float32))
             .at[2, :D_out].set(b3.reshape(-1).astype(jnp.float32)))

    wdtype = jnp.bfloat16 if use_bf16 else jnp.float32
    return {
        "w1": w1.astype(wdtype),
        "w2": w2.astype(wdtype),
        "w3": w3p.astype(wdtype),
        "b": b_all,
        "dims": (D_in, H1, H2, D_out, D_out_p),
    }


def qnetwork_forward(x, prepped, *, max_batch_tile=4096,
                     out_dtype=jnp.float32, xla_fallback_below=0):
    """Fused MLP forward using preprocessed params from prepare_qnetwork_params.

    Single grid step for small batches; tiles over batch (up to
    `max_batch_tile` rows per step) for large ones.  Output columns are
    zero-padded to a multiple of 128 inside the kernel for lane-dense stores
    and sliced back here.
    """
    D_in, H1, H2, D_out, D_out_p = prepped["dims"]
    w1, w2, w3, b_all = prepped["w1"], prepped["w2"], prepped["w3"], prepped["b"]

    B = x.shape[0]
    assert x.shape[1] == D_in

    # Tiny batches don't amortize pallas_call's fixed dispatch overhead; let
    # XLA fuse the MLP instead.  Disabled by default so the kernel runs here.
    if B < xla_fallback_below:
        h = jnp.maximum(x.astype(w1.dtype) @ w1 + b_all[0, :H1], 0.0)
        h = jnp.maximum(h.astype(w2.dtype) @ w2 + b_all[1, :H2], 0.0)
        y = h.astype(w3.dtype) @ w3 + b_all[2, :D_out_p]
        return y[:, :D_out].astype(out_dtype)

    # --- Batch tiling.  VMEM at 4096-row f32 tiles: 2x x-tile (0.5 MiB) +
    # 2x out-tile (2 MiB) + resident weights (~0.1 MiB) ~= 5 MiB — under the
    # default scoped limits on v5e (16 MiB), v6e/v7x (32 MiB).
    B_sub = _round_up(B, 8)                       # sublane alignment
    batch_tile = B_sub if B_sub <= max_batch_tile else max_batch_tile
    B_p = _round_up(B_sub, batch_tile)

    xp = x.astype(w1.dtype)
    if B_p != B:
        xp = jnp.zeros((B_p, D_in), xp.dtype).at[:B, :].set(xp)

    grid = (B_p // batch_tile,)

    in_specs = [
        pl.BlockSpec((batch_tile, D_in), lambda i: (i, 0)),
        pl.BlockSpec((D_in, H1), lambda i: (0, 0)),
        pl.BlockSpec((H1, H2), lambda i: (0, 0)),
        pl.BlockSpec((H2, D_out_p), lambda i: (0, 0)),
        pl.BlockSpec(tuple(b_all.shape), lambda i: (0, 0)),
    ]
    out_spec = pl.BlockSpec((batch_tile, D_out_p), lambda i: (i, 0))

    out_padded = pl.pallas_call(
        _mlp_kernel,
        out_shape=jax.ShapeDtypeStruct((B_p, D_out_p), out_dtype),
        grid=grid,
        in_specs=in_specs,
        out_specs=out_spec,
        compiler_params=pltpu.CompilerParams(
            # Batch tiles are independent: shard across v7x's two TensorCores;
            # measured no-op on v5e/v6e single-core chips.
            dimension_semantics=("parallel",),
        ),
    )(xp, w1, w2, w3, b_all)

    return out_padded[:B, :D_out]


def init_qnetwork_params(key, input_dim, hidden_units, output_dim):
    """Deterministic init mimicking nn.Linear's U(-1/sqrt(fan_in), 1/sqrt(fan_in)).

    Weights stored as [in, out] (transposed vs. PyTorch); biases as [1, out].
    """
    params = []
    dims = [input_dim] + list(hidden_units) + [output_dim]
    for d_in, d_out in zip(dims[:-1], dims[1:]):
        key, kw, kb = jax.random.split(key, 3)
        bound = 1.0 / math.sqrt(d_in)
        w = jax.random.uniform(kw, (d_in, d_out), jnp.float32, -bound, bound)
        b = jax.random.uniform(kb, (1, d_out), jnp.float32, -bound, bound)
        params.append((w, b))
    return params


def qnetwork_reference(x, params):
    """Plain-JAX reference of the same forward pass (f32)."""
    (w1, b1), (w2, b2), (w3, b3) = params
    h = jnp.maximum(x @ w1 + b1, 0.0)
    h = jnp.maximum(h @ w2 + b2, 0.0)
    return h @ w3 + b3


if __name__ == "__main__":
    INPUT_DIM = 32
    HIDDEN_UNITS = (64, 64)
    OUTPUT_DIM = 8
    BATCH = 16

    key = jax.random.PRNGKey(0)
    key, kx = jax.random.split(key)
    x = jax.random.normal(kx, (BATCH, INPUT_DIM), jnp.float32)

    params = init_qnetwork_params(key, INPUT_DIM, HIDDEN_UNITS, OUTPUT_DIM)

    # One-time preprocessing, hoisted out of the per-call path.
    # use_bf16=True is valid on v5e/v6e/v7x (f32 accumulation in-kernel), but
    # must be checked against a looser tolerance / bf16 reference.
    prepped = prepare_qnetwork_params(params, use_bf16=False)

    fwd = jax.jit(lambda v: qnetwork_forward(v, prepped))
    out = jax.block_until_ready(fwd(x))

    ref = qnetwork_reference(x, params)
    assert out.shape == (BATCH, OUTPUT_DIM)
    assert jnp.allclose(out, ref, atol=1e-5, rtol=1e-5), "mismatch vs reference"

    print("KERNEL_OK")
</pallas_src>

<mosaic_0001>
module attributes {stable_mosaic.version = 11 : i64} {
  func.func @_mlp_kernel(%arg0: i32, %arg1: memref<16x32xf32, #tpu.memory_space<vmem>>, %arg2: memref<32x64xf32, #tpu.memory_space<vmem>>, %arg3: memref<64x64xf32, #tpu.memory_space<vmem>>, %arg4: memref<64x128xf32, #tpu.memory_space<vmem>>, %arg5: memref<3x128xf32, #tpu.memory_space<vmem>>, %arg6: memref<16x128xf32, #tpu.memory_space<vmem>>) attributes {dimension_semantics = [#tpu.dimension_semantics<parallel>], iteration_bounds = array<i64: 1>, scalar_prefetch = 0 : i64, scratch_operands = 0 : i64, tpu.core_type = #tpu.core_type<tc>, window_params = [{transform_indices = @transform_0, window_bounds = array<i64: 16, 32>}, {pipeline_mode = #tpu.pipeline_mode<synchronous>, transform_indices = @transform_1, window_bounds = array<i64: 32, 64>}, {pipeline_mode = #tpu.pipeline_mode<synchronous>, transform_indices = @transform_2, window_bounds = array<i64: 64, 64>}, {pipeline_mode = #tpu.pipeline_mode<synchronous>, transform_indices = @transform_3, window_bounds = array<i64: 64, 128>}, {pipeline_mode = #tpu.pipeline_mode<synchronous>, transform_indices = @transform_4, window_bounds = array<i64: 3, 128>}, {transform_indices = @transform_5, window_bounds = array<i64: 16, 128>}]} {
    %c0 = arith.constant 0 : index
    %c0_0 = arith.constant 0 : index
    %0 = vector.load %arg1[%c0, %c0_0] : memref<16x32xf32, #tpu.memory_space<vmem>>, vector<16x32xf32>
    %c0_1 = arith.constant 0 : index
    %c0_2 = arith.constant 0 : index
    %1 = vector.load %arg2[%c0_1, %c0_2] : memref<32x64xf32, #tpu.memory_space<vmem>>, vector<32x64xf32>
    %cst = arith.constant dense<0.000000e+00> : vector<16x64xf32>
    %2 = tpu.matmul %0, %1, %cst {dimension_numbers = #tpu.dot_dimension_numbers<[1], [0], [0], [1], [0, 0, 1, 1], [], []>} : vector<16x32xf32>, vector<32x64xf32>, vector<16x64xf32> -> vector<16x64xf32>
    %c0_3 = arith.constant 0 : index
    %c0_4 = arith.constant 0 : index
    %3 = vector.load %arg5[%c0_3, %c0_4] : memref<3x128xf32, #tpu.memory_space<vmem>>, vector<1x64xf32>
    %4 = vector.broadcast %3 : vector<1x64xf32> to vector<16x64xf32>
    %5 = arith.addf %2, %4 : vector<16x64xf32>
    %cst_5 = arith.constant 0.000000e+00 : f32
    %6 = vector.broadcast %cst_5 : f32 to vector<16x64xf32>
    %7 = arith.maximumf %5, %6 : vector<16x64xf32>
    %c0_6 = arith.constant 0 : index
    %c0_7 = arith.constant 0 : index
    %8 = vector.load %arg3[%c0_6, %c0_7] : memref<64x64xf32, #tpu.memory_space<vmem>>, vector<64x64xf32>
    %cst_8 = arith.constant dense<0.000000e+00> : vector<16x64xf32>
    %9 = tpu.matmul %7, %8, %cst_8 {dimension_numbers = #tpu.dot_dimension_numbers<[1], [0], [0], [1], [0, 0, 1, 1], [], []>} : vector<16x64xf32>, vector<64x64xf32>, vector<16x64xf32> -> vector<16x64xf32>
    %c1 = arith.constant 1 : index
    %c0_9 = arith.constant 0 : index
    %10 = vector.load %arg5[%c1, %c0_9] : memref<3x128xf32, #tpu.memory_space<vmem>>, vector<1x64xf32>
    %11 = vector.broadcast %10 : vector<1x64xf32> to vector<16x64xf32>
    %12 = arith.addf %9, %11 : vector<16x64xf32>
    %cst_10 = arith.constant 0.000000e+00 : f32
    %13 = vector.broadcast %cst_10 : f32 to vector<16x64xf32>
    %14 = arith.maximumf %12, %13 : vector<16x64xf32>
    %c0_11 = arith.constant 0 : index
    %c0_12 = arith.constant 0 : index
    %15 = vector.load %arg4[%c0_11, %c0_12] : memref<64x128xf32, #tpu.memory_space<vmem>>, vector<64x128xf32>
    %cst_13 = arith.constant dense<0.000000e+00> : vector<16x128xf32>
    %16 = tpu.matmul %14, %15, %cst_13 {dimension_numbers = #tpu.dot_dimension_numbers<[1], [0], [0], [1], [0, 0, 1, 1], [], []>} : vector<16x64xf32>, vector<64x128xf32>, vector<16x128xf32> -> vector<16x128xf32>
    %c2 = arith.constant 2 : index
    %c0_14 = arith.constant 0 : index
    %17 = vector.load %arg5[%c2, %c0_14] : memref<3x128xf32, #tpu.memory_space<vmem>>, vector<1x128xf32>
    %18 = vector.broadcast %17 : vector<1x128xf32> to vector<16x128xf32>
    %19 = arith.addf %16, %18 : vector<16x128xf32>
    %c0_15 = arith.constant 0 : index
    %c0_16 = arith.constant 0 : index
    %20 = vector.load %arg6[%c0_15, %c0_16] : memref<16x128xf32, #tpu.memory_space<vmem>>, vector<16x128xf32>
    tpu.vector_store %arg6[%c0_15, %c0_16], %19 {strides = array<i32>} : memref<16x128xf32, #tpu.memory_space<vmem>>, vector<16x128xf32>,
    return
  }
  func.func @transform_0(%arg0: i32) -> (i32, i32) {
    %c0_i32 = arith.constant 0 : i32
    %c0_i32_0 = arith.constant 0 : i32
    return %arg0, %c0_i32 : i32, i32
  }
  func.func @transform_1(%arg0: i32) -> (i32, i32) {
    %c0_i32 = arith.constant 0 : i32
    %c0_i32_0 = arith.constant 0 : i32
    %c0_i32_1 = arith.constant 0 : i32
    return %c0_i32, %c0_i32_0 : i32, i32
  }
  func.func @transform_2(%arg0: i32) -> (i32, i32) {
    %c0_i32 = arith.constant 0 : i32
    %c0_i32_0 = arith.constant 0 : i32
    %c0_i32_1 = arith.constant 0 : i32
    return %c0_i32, %c0_i32_0 : i32, i32
  }
  func.func @transform_3(%arg0: i32) -> (i32, i32) {
    %c0_i32 = arith.constant 0 : i32
    %c0_i32_0 = arith.constant 0 : i32
    %c0_i32_1 = arith.constant 0 : i32
    return %c0_i32, %c0_i32_0 : i32, i32
  }
  func.func @transform_4(%arg0: i32) -> (i32, i32) {
    %c0_i32 = arith.constant 0 : i32
    %c0_i32_0 = arith.constant 0 : i32
    %c0_i32_1 = arith.constant 0 : i32
    return %c0_i32, %c0_i32_0 : i32, i32
  }
  func.func @transform_5(%arg0: i32) -> (i32, i32) {
    %c0_i32 = arith.constant 0 : i32
    %c0_i32_0 = arith.constant 0 : i32
    return %arg0, %c0_i32 : i32, i32
  }
}

</mosaic_0001>

<bundles_post_ra>
// kernel: _lambda_.1
= control target key start
LH: loop header
LB: loop body
LE: loop exit
PB: predicated region body
PF: predicated region fallthrough
CT: control target
= control target key end

     0   :  { %10 = vsyncpa [#allocation3], 0  ;;  %s725_s0 = inlined_call_operand.hbm [shape: f32[16,32], index: 0, kind: input, shape index: {}]   ;;  %s726_s1 = inlined_call_operand.hbm [shape: f32[32,64], index: 1, kind: input, shape index: {}]   ;;  %s727_s2 = inlined_call_operand.hbm [shape: f32[64,64], index: 2, kind: input, shape index: {}]   ;;  %s728_s3 = inlined_call_operand.hbm [shape: f32[64,128], index: 3, kind: input, shape index: {}]   ;;  %s729_s4 = inlined_call_operand.vmem [shape: f32[3,128], index: 4, kind: input, shape index: {}]   ;;  %s730_s5 = inlined_call_operand.vmem [shape: f32[16,128], index: 5, kind: output, shape index: {}]  }
   0x1   :  { %11 = vsyncpa [#allocation5], 0 }
   0x2   :  { %12 = vsyncpa [#allocation8], 0  ;;  %s594_s18 = smov [#allocation4]   ;;  %s595_s20 = smov [#allocation2]  }
   0x3   :  { %s30_s19 = sshll.u32 %s594_s18, 4  ;;  %s18_s21 = sshll.u32 %s595_s20, 4  ;;  %s31_s19 = int_to_ptr.vmem [resolvable:$true] %s30_s19  ;;  %s630_s21 = int_to_ptr.vmem [resolvable:$true] %s18_s21 }
   0x4   :  { %s500_s24 = scalar_lea.hbm %s726_s1, 512 }
   0x5   :  { %p501_p0 = scmp.ne.s32.totalorder %s726_s1, %s500_s24  ;;  %p504_p1 = scmp.lt.u32.totalorder %s500_s24, %s726_s1 }
   0x7   :  { %p506_p2 = pnand %p504_p1, %p501_p0 }
   0x9   :  { %509 = shalt.err (!%p506_p2)
}
   0xa   :  { %s510_s29 = scalar_lea.vmem %s31_s19, 512  ;;  %p515_p4 = scmp.lt.s32.totalorder %s31_s19, %s31_s19 }
   0xb   :  { %p511_p3 = scmp.ne.s32.totalorder %s31_s19, %s510_s29  ;;  %p516_p5 = scmp.lt.s32.totalorder %s510_s29, %s510_s29 }
   0xd   :  { %p517_p6 = por %p516_p5, %p515_p4 }
   0xf   :  { %p518_p7 = pnand %p517_p6, %p511_p3 }
  0x11   :  { %521 = shalt.err (!%p518_p7)
}
  0x12   :  { %s596_s30 = smov 128   ;;  %s597_s6 = smov 8  }
  0x13   :  { %36 = dma.hbm_to_vmem [thread:$0]  %s726_s1, 512, %s31_s19, [#allocation5], %s596_s30, %s596_s30, %s597_s6  }
  0x14   :  { %s522_s11 = scalar_lea.hbm %s725_s0, 256 }
  0x15   :  { %p523_p8 = scmp.ne.s32.totalorder %s725_s0, %s522_s11  ;;  %p526_p9 = scmp.lt.u32.totalorder %s522_s11, %s725_s0 }
  0x17   :  { %p528_p10 = pnand %p526_p9, %p523_p8 }
  0x19   :  { %531 = shalt.err (!%p528_p10)
}
  0x1a   :  { %s532_s16 = scalar_lea.vmem %s630_s21, 256  ;;  %p537_p12 = scmp.lt.s32.totalorder %s630_s21, %s630_s21 }
  0x1b   :  { %p533_p11 = scmp.ne.s32.totalorder %s630_s21, %s532_s16  ;;  %p538_p13 = scmp.lt.s32.totalorder %s532_s16, %s532_s16 }
  0x1d   :  { %p539_p0 = por %p538_p13, %p537_p12 }
  0x1f   :  { %p540_p1 = pnand %p539_p0, %p533_p11 }
  0x21   :  { %543 = shalt.err (!%p540_p1)
}
  0x22   :  { %24 = dma.hbm_to_vmem [thread:$0]  %s725_s0, 256, %s630_s21, [#allocation3], %s596_s30, %s596_s30, %s597_s6  }
  0x23   :  { %s598_s18 = smov [#allocation6]   ;;  %s599_s20 = smov [#allocation7]  }
  0x24   :  { %s42_s19 = sshll.u32 %s598_s18, 4  ;;  %s54_s22 = sshll.u32 %s599_s20, 4  ;;  %s43_s19 = int_to_ptr.vmem [resolvable:$true] %s42_s19  ;;  %s667_s22 = int_to_ptr.vmem [resolvable:$true] %s54_s22 }
  0x25   :  { %s544_s25 = scalar_lea.hbm %s727_s2, 1024 }
  0x26   :  { %p545_p2 = scmp.ne.s32.totalorder %s727_s2, %s544_s25  ;;  %p548_p3 = scmp.lt.u32.totalorder %s544_s25, %s727_s2 }
  0x28   :  { %p550_p4 = pnand %p548_p3, %p545_p2 }
  0x2a   :  { %553 = shalt.err (!%p550_p4)
}
  0x2b   :  { %s554_s0 = scalar_lea.vmem %s43_s19, 1024  ;;  %p559_p6 = scmp.lt.s32.totalorder %s43_s19, %s43_s19 }
  0x2c   :  { %p555_p5 = scmp.ne.s32.totalorder %s43_s19, %s554_s0  ;;  %p560_p7 = scmp.lt.s32.totalorder %s554_s0, %s554_s0 }
  0x2e   :  { %p561_p8 = por %p560_p7, %p559_p6 }
  0x30   :  { %p562_p9 = pnand %p561_p8, %p555_p5 }
  0x32   :  { %565 = shalt.err (!%p562_p9)
}
  0x33   :  { %48 = dma.hbm_to_vmem [thread:$0]  %s727_s2, 1024, %s43_s19, [#allocation5], %s596_s30, %s596_s30, %s597_s6  }
  0x34   :  { %s566_s10 = scalar_lea.hbm %s728_s3, 1024 }
  0x35   :  { %p567_p10 = scmp.ne.s32.totalorder %s728_s3, %s566_s10  ;;  %p570_p11 = scmp.lt.u32.totalorder %s566_s10, %s728_s3 }
  0x37   :  { %p572_p12 = pnand %p570_p11, %p567_p10 }
  0x39   :  { %575 = shalt.err (!%p572_p12)
}
  0x3a   :  { %s576_s15 = scalar_lea.vmem %s667_s22, 1024  ;;  %p581_p0 = scmp.lt.s32.totalorder %s667_s22, %s667_s22 }
  0x3b   :  { %p577_p13 = scmp.ne.s32.totalorder %s667_s22, %s576_s15  ;;  %p582_p1 = scmp.lt.s32.totalorder %s576_s15, %s576_s15 }
  0x3d   :  { %p583_p2 = por %p582_p1, %p581_p0 }
  0x3f   :  { %p584_p3 = pnand %p583_p2, %p577_p13 }
  0x41   :  { %587 = shalt.err (!%p584_p3)
}
  0x42   :  { %60 = dma.hbm_to_vmem [thread:$0]  %s728_s3, 1024, %s667_s22, [#allocation8], %s596_s30, %s596_s30, %s597_s6  }
  0x43   :  { %588 = dma.done.wait [#allocation3], 256  }
  0x44   :  { %589 = vsyncadd [#allocation3], 4294967040 }
  0x45   :  { %590 = dma.done.wait [#allocation5], 1536  }
  0x46   :  { %591 = vsyncadd [#allocation5], 4294965760 }
  0x47   :  { %592 = dma.done.wait [#allocation8], 1024  }
  0x48   :  { %593 = vsyncadd [#allocation8], 4294966272  ;;  %vm86_vm0 = vcmask 261120   ;;  %v77_v0 = vld [vmem:[#allocation4] sm:$0xff]  ;;  %v78_v1 = vld [vmem:[#allocation4 + $0x8] sm:$0xff]  ;;  %vm183_vm1 = vcmask 523264  }
  0x49   :  { %v79_v2 = vld [vmem:[#allocation4 + $0x10] sm:$0xff]  ;;  %v454_v3 = vpack.c.bf16 %v78_v1, %v77_v0  ;;  %v80_v4 = vld [vmem:[#allocation4 + $0x18] sm:$0xff]  ;;  %v170_v7 = vld [vmem:[#allocation6] sm:$0xff] }
  0x4a   :  { %v75_v5 = vld [vmem:[#allocation2] sm:$0xff]  ;;  %v458_v6 = vpack.c.bf16 %v80_v4, %v79_v2  ;;  %v171_v8 = vld [vmem:[#allocation6 + $0x8] sm:$0xff]  ;;  %v173_v11 = vld [vmem:[#allocation6 + $0x18] sm:$0xff] }
  0x4b   :  { %413 = vmatprep.mubr.msk.f32.mxu0 %vm86_vm0, %v75_v5  ;;  %v172_v9 = vld [vmem:[#allocation6 + $0x10] sm:$0xff]  ;;  %455 = vmatprep.subr.bf16.mxu0 %v454_v3  ;;  %v462_v10 = vpack.c.bf16 %v171_v8, %v170_v7  ;;  %v174_v13 = vld [vmem:[#allocation6 + $0x20] sm:$0xff]  ;;  %v175_v14 = vld [vmem:[#allocation6 + $0x28] sm:$0xff] }
  0x4c   :  { %457 = vmatpush3.bf16.msra.mxu0 %v454_v3  ;;  %v466_v12 = vpack.c.bf16 %v173_v11, %v172_v9  ;;  %v470_v15 = vpack.c.bf16 %v175_v14, %v174_v13  ;;  %v76_v16 = vld [vmem:[#allocation2 + $0x8] sm:$0xff]  ;;  %v176_v17 = vld [vmem:[#allocation6 + $0x30] sm:$0xff]  ;;  %v267_v20 = vld [vmem:[#allocation7] sm:$0xff] }
  0x4d   :  { %459 = vmatprep.subr.bf16.mxu0 %v458_v6  ;;  %463 = vmatprep.subr.bf16.mxu1 %v462_v10  ;;  %v177_v18 = vld [vmem:[#allocation6 + $0x38] sm:$0xff]  ;;  %v268_v21 = vld [vmem:[#allocation7 + $0x8] sm:$0xff]  ;;  %v269_v22 = vld [vmem:[#allocation7 + $0x10] sm:$0xff] }
  0x4e   :  { %465 = vmatpush3.bf16.msra.mxu1 %v462_v10  ;;  %v474_v19 = vpack.c.bf16 %v177_v18, %v176_v17  ;;  %v478_v23 = vpack.c.bf16 %v268_v21, %v267_v20  ;;  %v270_v24 = vld [vmem:[#allocation7 + $0x18] sm:$0xff]  ;;  %v271_v26 = vld [vmem:[#allocation7 + $0x20] sm:$0xff]  ;;  %v272_v27 = vld [vmem:[#allocation7 + $0x28] sm:$0xff] }
  0x4f   :  { %467 = vmatprep.subr.bf16.mxu1 %v466_v12  ;;  %v482_v25 = vpack.c.bf16 %v270_v24, %v269_v22  ;;  %v486_v28 = vpack.c.bf16 %v272_v27, %v271_v26  ;;  %v370_v29 = vld [vmem:[%s729_s4] ss:$0 sm:$0xff]  ;;  %v274_v37 = vld [vmem:[#allocation7 + $0x38] sm:$0xff]  ;;  %v373_v39 = vld [vmem:[%s729_s4 + $0x1] ss:$0 sm:$0xff] }
  0x50   :  { %461 = vmatpush3.bf16.msra.mxu0 %v458_v6  ;;  %v273_v36 = vld [vmem:[#allocation7 + $0x30] sm:$0xff] }
  0x51   :  { %479 = vmatprep.subr.bf16.mxu0 %v478_v23  ;;  %v490_v38 = vpack.c.bf16 %v274_v37, %v273_v36  ;;  %v376_v46 = vld [vmem:[%s729_s4 + $0x2] ss:$0 sm:$0xff] }
  0x52   :  { %469 = vmatpush3.bf16.msra.mxu1 %v466_v12 }
  0x53   :  { %414 = vmatmul.mubr.msk.f32.vlgmr.msra.gmra.mrb[0].mxu0 %vm86_vm0, %v76_v16  ;;  %471 = vmatprep.subr.bf16.mxu1 %v470_v15 }
  0x54   :  { %481 = vmatpush3.bf16.msra.mxu0 %v478_v23 }
  0x55   :  { %483 = vmatprep.subr.bf16.mxu0 %v482_v25 }
  0x56   :  { %473 = vmatpush3.bf16.msra.mxu1 %v470_v15 }
  0x57   :  { %475 = vmatprep.subr.bf16.mxu1 %v474_v19 }
  0x58   :  { %485 = vmatpush3.bf16.msra.mxu0 %v482_v25 }
  0x59   :  { %487 = vmatprep.subr.bf16.mxu0 %v486_v28 }
  0x5a   :  { %477 = vmatpush3.bf16.msra.mxu1 %v474_v19 }
  0x5c   :  { %489 = vmatpush3.bf16.msra.mxu0 %v486_v28 }
  0x5d   :  { %491 = vmatprep.subr.bf16.mxu0 %v490_v38 }
  0x60   :  { %493 = vmatpush3.bf16.msra.mxu0 %v490_v38 }
 0x126   :  { %v415_v30 = vpop.f32.mrb[0].mxu0 }
 0x127   :  { %v165_v31 = vadd.f32 %v415_v30, %v370_v29  ;;  %v159_v32 = vpop.f32.mrb[1].mxu0 }
 0x128   :  { %v160_v33 = vadd.f32 %v370_v29, %v159_v32 }
 0x129   :  { %v169_v35 = vmax.f32 %v165_v31, 0.0 }
 0x12a   :  { %v168_v34 = vmax.f32 %v160_v33, 0.0 }
 0x12c   :  { %432 = vmatprep.mubr.msk.f32.mxu1 %vm183_vm1, %v168_v34 }
 0x12d   :  { %433 = vmatmul.mubr.msk.f32.vlgmr.msra.gmra.mrb[0].mxu1 %vm183_vm1, %v169_v35 }
 0x200   :  { %v434_v40 = vpop.f32.mrb[0].mxu1 }
 0x201   :  { %v262_v41 = vadd.f32 %v434_v40, %v373_v39  ;;  %v256_v42 = vpop.f32.mrb[1].mxu1 }
 0x202   :  { %v257_v43 = vadd.f32 %v373_v39, %v256_v42 }
 0x203   :  { %v266_v45 = vmax.f32 %v262_v41, 0.0 }
 0x204   :  { %v265_v44 = vmax.f32 %v257_v43, 0.0 }
 0x206   :  { %451 = vmatprep.mubr.msk.f32.mxu0 %vm183_vm1, %v265_v44 }
 0x207   :  { %452 = vmatmul.mubr.msk.f32.vlgmr.msra.gmra.mrb[2].mxu0 %vm183_vm1, %v266_v45 }
 0x2da   :  { %v453_v47 = vpop.f32.mrb[2].mxu0 }
 0x2db   :  { %v358_v48 = vadd.f32 %v453_v47, %v376_v46  ;;  %v352_v49 = vpop.f32.mrb[3].mxu0 }
 0x2dc   :  { %v353_v50 = vadd.f32 %v376_v46, %v352_v49 }
 0x2dd   :  { %362 = vst [vmem:[%s730_s5 + $0x8] sm:$0xff] %v358_v48 }
 0x2de   :  { %361 = vst [vmem:[%s730_s5] sm:$0xff] %v353_v50 }
 0x2df   :  { %367 = vsyncpa [#allocation3], 1 }
 0x2e0   :  { %368 = vsyncpa [#allocation5], 1 }
 0x2e1   :  { %369 = vsyncpa [#allocation8], 1 }

</bundles_post_ra>
